<compile_context>
chip_gen: v7x
topology: tpu7x:2x2x1
jax: 0.10.0
libtpu: 0.0.40
codegen_flags: <defaults>
</compile_context>

<pallas_src>
import functools

import jax
import jax.numpy as jnp
from jax.experimental import pallas as pl
from jax.experimental.pallas import tpu as pltpu


def _round_up(x, m):
    return (x + m - 1) // m * m


# ----------------------------- Pallas kernel ------------------------------ #
def _conv_bn_relu_kernel(x_ref, w_ref, b_ref, o_ref, *, shifts):
    """Fused conv (shifted-dot form) + folded-BN bias + ReLU for one image.

    x_ref: (C, L_in)   zero-padded, flattened padded input image
    w_ref: (T, OC, C)  per-tap weights, BN scale already folded in
    b_ref: (OC, 1)     folded BN bias
    o_ref: (OC, L_out) flattened output over the padded spatial grid
    """
    L = o_ref.shape[-1]
    x = x_ref[...]                                  # one VMEM load, reused by all taps
    acc = jnp.zeros(o_ref.shape, jnp.float32)
    for t, s in enumerate(shifts):                  # static unroll over KH*KW taps
        acc = acc + jnp.dot(w_ref[t], x[:, s:s + L],
                            preferred_element_type=jnp.float32)
    # Epilogue in f32 (safe on v5e: no bf16 VPU math needed).
    o_ref[...] = jnp.maximum(acc + b_ref[...], 0.0).astype(o_ref.dtype)


# ------------------------------ ConvBlock --------------------------------- #
def conv_block_forward(x, weight, gamma, beta, running_mean, running_var,
                       *, kernel_size, dilation, stride=1, eps=1e-5):
    """x: (N, C, H, W) f32.  weight: (OC, C, KH, KW).  Returns (N, OC, OH, OW)."""
    N, C, H, W = x.shape
    OC = weight.shape[0]
    KH, KW = kernel_size
    dh, dw = dilation
    ph = (KH - 1) // 2 * dh
    pw = (KW - 1) // 2 * dw
    Hp, Wp = H + 2 * ph, W + 2 * pw
    OH = (H + 2 * ph - dh * (KH - 1) - 1) // stride + 1
    OW = (W + 2 * pw - dw * (KW - 1) - 1) // stride + 1

    # Pure per-tap flat shifts (no im2col): tap (kh,kw) -> q + kh*dh*Wp + kw*dw.
    shifts = tuple(kh * dh * Wp + kw * dw
                   for kh in range(KH) for kw in range(KW))
    max_shift = shifts[-1]
    h_rows = (OH - 1) * stride + 1
    L_valid = h_rows * Wp                       # flat range containing all valid q
    L_out = _round_up(L_valid, 128)             # lane-dense output block
    L_in = _round_up(L_out + max_shift, 128)    # room for the largest tap shift

    # Pad spatially, flatten per image, zero-pad the flat tail.
    xp = jnp.pad(x, ((0, 0), (0, 0), (ph, ph), (pw, pw)))
    x_flat = xp.reshape(N, C, Hp * Wp).astype(jnp.float32)
    x_flat = jnp.pad(x_flat, ((0, 0), (0, 0), (0, L_in - Hp * Wp)))
    # (On v6e/v7x, x_flat / w_taps could be cast to bf16 for the MXU with a
    #  loosened tolerance; kept f32 here to match the f32 PyTorch module.)

    # Fold BatchNorm (eval) scale into the weights; keep only a bias epilogue.
    scale = gamma / jnp.sqrt(running_var + eps)
    w_folded = weight.astype(jnp.float32) * scale[:, None, None, None]
    w_taps = w_folded.transpose(2, 3, 0, 1).reshape(KH * KW, OC, C)
    bias = (beta - running_mean * scale).reshape(OC, 1).astype(jnp.float32)

    kernel = functools.partial(_conv_bn_relu_kernel, shifts=shifts)
    flops = 2 * N * (KH * KW) * OC * C * L_out
    bytes_accessed = 4 * (N * C * L_in + KH * KW * OC * C + OC + N * OC * L_out)

    out_flat = pl.pallas_call(
        kernel,
        out_shape=jax.ShapeDtypeStruct((N, OC, L_out), jnp.float32),
        grid_spec=pltpu.PrefetchScalarGridSpec(
            num_scalar_prefetch=0,
            grid=(N,),
            in_specs=[
                pl.BlockSpec((None, C, L_in), lambda n: (n, 0, 0)),      # image
                pl.BlockSpec((KH * KW, OC, C), lambda n: (0, 0, 0)),     # weights
                pl.BlockSpec((OC, 1), lambda n: (0, 0)),                 # BN bias
            ],
            out_specs=pl.BlockSpec((None, OC, L_out), lambda n: (n, 0, 0)),
        ),
        compiler_params=pltpu.CompilerParams(
            dimension_semantics=("parallel",)),
        cost_estimate=pl.CostEstimate(
            flops=flops, transcendentals=0, bytes_accessed=bytes_accessed),
    )(x_flat, w_taps, bias)

    # Already NC(HW)-ordered: reshape + slice only (no transpose pass).
    y = out_flat[:, :, :L_valid].reshape(N, OC, h_rows, Wp)
    y = y[:, :, ::stride, ::stride][:, :, :OH, :OW]
    return y


# ------------------------------- reference -------------------------------- #
def conv_block_reference(x, weight, gamma, beta, running_mean, running_var,
                         *, kernel_size, dilation, stride=1, eps=1e-5):
    KH, KW = kernel_size
    dh, dw = dilation
    ph = (KH - 1) // 2 * dh
    pw = (KW - 1) // 2 * dw
    y = jax.lax.conv_general_dilated(
        x, weight, window_strides=(stride, stride),
        padding=((ph, ph), (pw, pw)), rhs_dilation=(dh, dw),
        dimension_numbers=("NCHW", "OIHW", "NCHW"))
    scale = (gamma / jnp.sqrt(running_var + eps)).reshape(1, -1, 1, 1)
    shift = (beta - running_mean * gamma / jnp.sqrt(running_var + eps)).reshape(1, -1, 1, 1)
    return jnp.maximum(y * scale + shift, 0.0)


# --------------------------------- main ------------------------------------ #
if __name__ == "__main__":
    # ConvBlock(in_channels=4, out_channels=8, kernel_size=(3,3), dilation=(1,1),
    #           stride=1, norm_fn='bn', act='relu')
    in_channels, out_channels = 4, 8
    kernel_size, dilation, stride = (3, 3), (1, 1), 1

    key = jax.random.PRNGKey(0)
    kx, kw, kg, kb, km, kv = jax.random.split(key, 6)

    x = jax.random.normal(kx, (2, in_channels, 16, 16), dtype=jnp.float32)
    weight = 0.1 * jax.random.normal(
        kw, (out_channels, in_channels, *kernel_size), dtype=jnp.float32)
    gamma = 1.0 + 0.1 * jax.random.normal(kg, (out_channels,), dtype=jnp.float32)
    beta = 0.1 * jax.random.normal(kb, (out_channels,), dtype=jnp.float32)
    running_mean = 0.1 * jax.random.normal(km, (out_channels,), dtype=jnp.float32)
    running_var = jnp.abs(1.0 + 0.1 * jax.random.normal(kv, (out_channels,),
                                                        dtype=jnp.float32))

    fwd = functools.partial(conv_block_forward,
                            kernel_size=kernel_size, dilation=dilation,
                            stride=stride)
    out = jax.jit(fwd)(x, weight, gamma, beta, running_mean, running_var)
    out = jax.block_until_ready(out)

    ref = conv_block_reference(x, weight, gamma, beta, running_mean, running_var,
                               kernel_size=kernel_size, dilation=dilation,
                               stride=stride)
    assert out.shape == (2, out_channels, 16, 16)
    assert jnp.allclose(out, ref, atol=1e-4, rtol=1e-4)

    print("KERNEL_OK")
</pallas_src>

<mosaic_0001>
module attributes {stable_mosaic.version = 11 : i64} {
  func.func @_conv_bn_relu_kernel(%arg0: i32, %arg1: memref<1x4x512xf32, #tpu.memory_space<vmem>>, %arg2: memref<9x8x4xf32, #tpu.memory_space<vmem>>, %arg3: memref<8x1xf32, #tpu.memory_space<vmem>>, %arg4: memref<1x8x384xf32, #tpu.memory_space<vmem>>) attributes {dimension_semantics = [#tpu.dimension_semantics<parallel>], iteration_bounds = array<i64: 2>, scalar_prefetch = 0 : i64, scratch_operands = 0 : i64, tpu.core_type = #tpu.core_type<tc>, window_params = [{transform_indices = @transform_0, window_bounds = array<i64: 1, 4, 512>}, {pipeline_mode = #tpu.pipeline_mode<synchronous>, transform_indices = @transform_1, window_bounds = array<i64: 9, 8, 4>}, {pipeline_mode = #tpu.pipeline_mode<synchronous>, transform_indices = @transform_2, window_bounds = array<i64: 8, 1>}, {transform_indices = @transform_3, window_bounds = array<i64: 1, 8, 384>}]} {
    %c0 = arith.constant 0 : index
    %c0_0 = arith.constant 0 : index
    %c0_1 = arith.constant 0 : index
    %0 = vector.load %arg1[%c0, %c0_0, %c0_1] : memref<1x4x512xf32, #tpu.memory_space<vmem>>, vector<1x4x512xf32>
    %1 = vector.shape_cast %0 : vector<1x4x512xf32> to vector<4x512xf32>
    %cst = arith.constant 0.000000e+00 : f32
    %2 = vector.broadcast %cst : f32 to vector<8x384xf32>
    %c0_2 = arith.constant 0 : index
    %c0_3 = arith.constant 0 : index
    %c0_4 = arith.constant 0 : index
    %3 = vector.load %arg2[%c0_2, %c0_3, %c0_4] : memref<9x8x4xf32, #tpu.memory_space<vmem>>, vector<1x8x4xf32>
    %4 = vector.shape_cast %3 : vector<1x8x4xf32> to vector<8x4xf32>
    %5 = vector.extract_strided_slice %1 {offsets = [0, 0], sizes = [4, 384], strides = [1, 1]} : vector<4x512xf32> to vector<4x384xf32>
    %cst_5 = arith.constant dense<0.000000e+00> : vector<8x384xf32>
    %6 = tpu.matmul %4, %5, %cst_5 {dimension_numbers = #tpu.dot_dimension_numbers<[1], [0], [0], [1], [0, 0, 1, 1], [], []>} : vector<8x4xf32>, vector<4x384xf32>, vector<8x384xf32> -> vector<8x384xf32>
    %7 = arith.addf %2, %6 : vector<8x384xf32>
    %c1 = arith.constant 1 : index
    %c0_6 = arith.constant 0 : index
    %c0_7 = arith.constant 0 : index
    %8 = vector.load %arg2[%c1, %c0_6, %c0_7] : memref<9x8x4xf32, #tpu.memory_space<vmem>>, vector<1x8x4xf32>
    %9 = vector.shape_cast %8 : vector<1x8x4xf32> to vector<8x4xf32>
    %10 = vector.extract_strided_slice %1 {offsets = [0, 1], sizes = [4, 384], strides = [1, 1]} : vector<4x512xf32> to vector<4x384xf32>
    %cst_8 = arith.constant dense<0.000000e+00> : vector<8x384xf32>
    %11 = tpu.matmul %9, %10, %cst_8 {dimension_numbers = #tpu.dot_dimension_numbers<[1], [0], [0], [1], [0, 0, 1, 1], [], []>} : vector<8x4xf32>, vector<4x384xf32>, vector<8x384xf32> -> vector<8x384xf32>
    %12 = arith.addf %7, %11 : vector<8x384xf32>
    %c2 = arith.constant 2 : index
    %c0_9 = arith.constant 0 : index
    %c0_10 = arith.constant 0 : index
    %13 = vector.load %arg2[%c2, %c0_9, %c0_10] : memref<9x8x4xf32, #tpu.memory_space<vmem>>, vector<1x8x4xf32>
    %14 = vector.shape_cast %13 : vector<1x8x4xf32> to vector<8x4xf32>
    %15 = vector.extract_strided_slice %1 {offsets = [0, 2], sizes = [4, 384], strides = [1, 1]} : vector<4x512xf32> to vector<4x384xf32>
    %cst_11 = arith.constant dense<0.000000e+00> : vector<8x384xf32>
    %16 = tpu.matmul %14, %15, %cst_11 {dimension_numbers = #tpu.dot_dimension_numbers<[1], [0], [0], [1], [0, 0, 1, 1], [], []>} : vector<8x4xf32>, vector<4x384xf32>, vector<8x384xf32> -> vector<8x384xf32>
    %17 = arith.addf %12, %16 : vector<8x384xf32>
    %c3 = arith.constant 3 : index
    %c0_12 = arith.constant 0 : index
    %c0_13 = arith.constant 0 : index
    %18 = vector.load %arg2[%c3, %c0_12, %c0_13] : memref<9x8x4xf32, #tpu.memory_space<vmem>>, vector<1x8x4xf32>
    %19 = vector.shape_cast %18 : vector<1x8x4xf32> to vector<8x4xf32>
    %20 = vector.extract_strided_slice %1 {offsets = [0, 18], sizes = [4, 384], strides = [1, 1]} : vector<4x512xf32> to vector<4x384xf32>
    %cst_14 = arith.constant dense<0.000000e+00> : vector<8x384xf32>
    %21 = tpu.matmul %19, %20, %cst_14 {dimension_numbers = #tpu.dot_dimension_numbers<[1], [0], [0], [1], [0, 0, 1, 1], [], []>} : vector<8x4xf32>, vector<4x384xf32>, vector<8x384xf32> -> vector<8x384xf32>
    %22 = arith.addf %17, %21 : vector<8x384xf32>
    %c4 = arith.constant 4 : index
    %c0_15 = arith.constant 0 : index
    %c0_16 = arith.constant 0 : index
    %23 = vector.load %arg2[%c4, %c0_15, %c0_16] : memref<9x8x4xf32, #tpu.memory_space<vmem>>, vector<1x8x4xf32>
    %24 = vector.shape_cast %23 : vector<1x8x4xf32> to vector<8x4xf32>
    %25 = vector.extract_strided_slice %1 {offsets = [0, 19], sizes = [4, 384], strides = [1, 1]} : vector<4x512xf32> to vector<4x384xf32>
    %cst_17 = arith.constant dense<0.000000e+00> : vector<8x384xf32>
    %26 = tpu.matmul %24, %25, %cst_17 {dimension_numbers = #tpu.dot_dimension_numbers<[1], [0], [0], [1], [0, 0, 1, 1], [], []>} : vector<8x4xf32>, vector<4x384xf32>, vector<8x384xf32> -> vector<8x384xf32>
    %27 = arith.addf %22, %26 : vector<8x384xf32>
    %c5 = arith.constant 5 : index
    %c0_18 = arith.constant 0 : index
    %c0_19 = arith.constant 0 : index
    %28 = vector.load %arg2[%c5, %c0_18, %c0_19] : memref<9x8x4xf32, #tpu.memory_space<vmem>>, vector<1x8x4xf32>
    %29 = vector.shape_cast %28 : vector<1x8x4xf32> to vector<8x4xf32>
    %30 = vector.extract_strided_slice %1 {offsets = [0, 20], sizes = [4, 384], strides = [1, 1]} : vector<4x512xf32> to vector<4x384xf32>
    %cst_20 = arith.constant dense<0.000000e+00> : vector<8x384xf32>
    %31 = tpu.matmul %29, %30, %cst_20 {dimension_numbers = #tpu.dot_dimension_numbers<[1], [0], [0], [1], [0, 0, 1, 1], [], []>} : vector<8x4xf32>, vector<4x384xf32>, vector<8x384xf32> -> vector<8x384xf32>
    %32 = arith.addf %27, %31 : vector<8x384xf32>
    %c6 = arith.constant 6 : index
    %c0_21 = arith.constant 0 : index
    %c0_22 = arith.constant 0 : index
    %33 = vector.load %arg2[%c6, %c0_21, %c0_22] : memref<9x8x4xf32, #tpu.memory_space<vmem>>, vector<1x8x4xf32>
    %34 = vector.shape_cast %33 : vector<1x8x4xf32> to vector<8x4xf32>
    %35 = vector.extract_strided_slice %1 {offsets = [0, 36], sizes = [4, 384], strides = [1, 1]} : vector<4x512xf32> to vector<4x384xf32>
    %cst_23 = arith.constant dense<0.000000e+00> : vector<8x384xf32>
    %36 = tpu.matmul %34, %35, %cst_23 {dimension_numbers = #tpu.dot_dimension_numbers<[1], [0], [0], [1], [0, 0, 1, 1], [], []>} : vector<8x4xf32>, vector<4x384xf32>, vector<8x384xf32> -> vector<8x384xf32>
    %37 = arith.addf %32, %36 : vector<8x384xf32>
    %c7 = arith.constant 7 : index
    %c0_24 = arith.constant 0 : index
    %c0_25 = arith.constant 0 : index
    %38 = vector.load %arg2[%c7, %c0_24, %c0_25] : memref<9x8x4xf32, #tpu.memory_space<vmem>>, vector<1x8x4xf32>
    %39 = vector.shape_cast %38 : vector<1x8x4xf32> to vector<8x4xf32>
    %40 = vector.extract_strided_slice %1 {offsets = [0, 37], sizes = [4, 384], strides = [1, 1]} : vector<4x512xf32> to vector<4x384xf32>
    %cst_26 = arith.constant dense<0.000000e+00> : vector<8x384xf32>
    %41 = tpu.matmul %39, %40, %cst_26 {dimension_numbers = #tpu.dot_dimension_numbers<[1], [0], [0], [1], [0, 0, 1, 1], [], []>} : vector<8x4xf32>, vector<4x384xf32>, vector<8x384xf32> -> vector<8x384xf32>
    %42 = arith.addf %37, %41 : vector<8x384xf32>
    %c8 = arith.constant 8 : index
    %c0_27 = arith.constant 0 : index
    %c0_28 = arith.constant 0 : index
    %43 = vector.load %arg2[%c8, %c0_27, %c0_28] : memref<9x8x4xf32, #tpu.memory_space<vmem>>, vector<1x8x4xf32>
    %44 = vector.shape_cast %43 : vector<1x8x4xf32> to vector<8x4xf32>
    %45 = vector.extract_strided_slice %1 {offsets = [0, 38], sizes = [4, 384], strides = [1, 1]} : vector<4x512xf32> to vector<4x384xf32>
    %cst_29 = arith.constant dense<0.000000e+00> : vector<8x384xf32>
    %46 = tpu.matmul %44, %45, %cst_29 {dimension_numbers = #tpu.dot_dimension_numbers<[1], [0], [0], [1], [0, 0, 1, 1], [], []>} : vector<8x4xf32>, vector<4x384xf32>, vector<8x384xf32> -> vector<8x384xf32>
    %47 = arith.addf %42, %46 : vector<8x384xf32>
    %c0_30 = arith.constant 0 : index
    %c0_31 = arith.constant 0 : index
    %48 = vector.load %arg3[%c0_30, %c0_31] : memref<8x1xf32, #tpu.memory_space<vmem>>, vector<8x1xf32>
    %49 = vector.broadcast %48 : vector<8x1xf32> to vector<8x384xf32>
    %50 = arith.addf %47, %49 : vector<8x384xf32>
    %cst_32 = arith.constant 0.000000e+00 : f32
    %51 = vector.broadcast %cst_32 : f32 to vector<8x384xf32>
    %52 = arith.maximumf %50, %51 : vector<8x384xf32>
    %c0_33 = arith.constant 0 : index
    %c0_34 = arith.constant 0 : index
    %c0_35 = arith.constant 0 : index
    %53 = vector.load %arg4[%c0_33, %c0_34, %c0_35] : memref<1x8x384xf32, #tpu.memory_space<vmem>>, vector<1x8x384xf32>
    %54 = vector.shape_cast %53 : vector<1x8x384xf32> to vector<8x384xf32>
    %55 = vector.shape_cast %52 : vector<8x384xf32> to vector<1x8x384xf32>
    tpu.vector_store %arg4[%c0_33, %c0_34, %c0_35], %55 {strides = array<i32>} : memref<1x8x384xf32, #tpu.memory_space<vmem>>, vector<1x8x384xf32>,
    return
  }
  func.func @transform_0(%arg0: i32) -> (i32, i32, i32) {
    %c0_i32 = arith.constant 0 : i32
    %c0_i32_0 = arith.constant 0 : i32
    %c0_i32_1 = arith.constant 0 : i32
    return %arg0, %c0_i32, %c0_i32_0 : i32, i32, i32
  }
  func.func @transform_1(%arg0: i32) -> (i32, i32, i32) {
    %c0_i32 = arith.constant 0 : i32
    %c0_i32_0 = arith.constant 0 : i32
    %c0_i32_1 = arith.constant 0 : i32
    %c0_i32_2 = arith.constant 0 : i32
    return %c0_i32, %c0_i32_0, %c0_i32_1 : i32, i32, i32
  }
  func.func @transform_2(%arg0: i32) -> (i32, i32) {
    %c0_i32 = arith.constant 0 : i32
    %c0_i32_0 = arith.constant 0 : i32
    %c0_i32_1 = arith.constant 0 : i32
    return %c0_i32, %c0_i32_0 : i32, i32
  }
  func.func @transform_3(%arg0: i32) -> (i32, i32, i32) {
    %c0_i32 = arith.constant 0 : i32
    %c0_i32_0 = arith.constant 0 : i32
    %c0_i32_1 = arith.constant 0 : i32
    return %arg0, %c0_i32, %c0_i32_0 : i32, i32, i32
  }
}

</mosaic_0001>

<bundles_post_ra>
// kernel: conv_block_forward.1
= control target key start
LH: loop header
LB: loop body
LE: loop exit
PB: predicated region body
PF: predicated region fallthrough
CT: control target
= control target key end

     0   :  { %s1938_s12 = smov 0   ;;  %s2117_s0 = inlined_call_operand.vmem [shape: f32[2,4,512], index: 0, kind: input, shape index: {}]   ;;  %s2118_s1 = inlined_call_operand.vmem [shape: f32[9,8,4], index: 1, kind: input, shape index: {}]   ;;  %s2119_s2 = inlined_call_operand.vmem [shape: f32[8,1], index: 2, kind: input, shape index: {}]   ;;  %s2120_s3 = inlined_call_operand.vmem [shape: f32[2,8,384], index: 3, kind: output, shape index: {}]  }
   0x1 LB: > { %s1733_s13 = sadd.s32 4294967295, %s1905_s12   ;;  %p1737_p0 = scmp.ge.s32.totalorder %s1905_s12, 1  ;;  %s1905_s12 = sphi %s1938_s12, %s13_s12  }
   0x2   : > { %p137_p1 = scmp.lt.s32.totalorder %s1905_s12, 3 }
   0x4   : > { %p138_p2 = pnand %p1737_p0, %p137_p1 }
   0x5   : > { %p161_p3 = scmp.lt.s32.totalorder (!%p138_p2), %s1733_s13, 1  ;;  %v1907_v0 = vmov (!%p138_p2), 0.0   ;;  %s1908_s18 = smov (!%p138_p2), 127   ;;  %vm1910_vm0 = vmmov (!%p138_p2), 0   ;;  %v1917_v5 = vmov (!%p138_p2), 0   ;;  %v1663_v6 = vld [vmem:[%s2119_s2] sm:$0xff] (!%p138_p2) }
   0x6   : > { %141 = sbr.rel (%p138_p2) target bundleno = 423 (0x1a7), region = 32  ;;  %267 = vmatprep.mubr.f32.mxu0 (!%p138_p2), %v1907_v0  ;;  %1815 = vmatprep.subr.mxu1 (!%p138_p2), %v1907_v0  ;;  %s1909_s19 = smov (!%p138_p2), 126   ;;  %vm188_vm1 = vcmask (!%p138_p2), 1039360   ;;  %vm196_vm2 = vcmask (!%p138_p2), 1043456   ;;  %v1741_v12 = vld [vmem:[%s2118_s1 + $0x8] sm:$0xff] (!%p138_p2)  ;;  %vm192_vm3 = vcmask (!%p138_p2), 31744  }
   0x7   : > { %1817 = vmatprep.mubr.msk.f32.mxu1 (!%p138_p2), %vm1910_vm0, %v1907_v0  ;;  %s1911_s20 = smov (!%p138_p2), 110   ;;  %s1912_s21 = smov (!%p138_p2), 109   ;;  %1896 = vset.pattern.permute.xlu0 (!%p138_p2), %v1917_v5  ;;  %vm504_vm4 = vcmask (!%p138_p2), 1031168   ;;  %vm671_vm5 = vcmask (!%p138_p2), 900096   ;;  %v173_v19 = vld [vmem:[%s2118_s1] sm:$0xff] (!%p138_p2)  ;;  %vm838_vm6 = vcmask (!%p138_p2), 891904  }
   0x8   : > { %s1913_s22 = smov (!%p138_p2), 108   ;;  %s1914_s23 = smov (!%p138_p2), 92   ;;  %v1752_v27 = vld [vmem:[%s2118_s1 + $0x10] sm:$0xff] (!%p138_p2)  ;;  %vm1005_vm7 = vcmask (!%p138_p2), 883712   ;;  %v1758_v35 = vld [vmem:[%s2118_s1 + $0x18] sm:$0xff] (!%p138_p2)  ;;  %v1764_v44 = vld [vmem:[%s2118_s1 + $0x20] sm:$0xff] (!%p138_p2) }
   0x9   : > { %s1915_s24 = smov (!%p138_p2), 91   ;;  %s1916_s25 = smov (!%p138_p2), 90   ;;  %vm1172_vm8 = vcmask (!%p138_p2), 752640   ;;  %v1770_v51 = vld [vmem:[%s2118_s1 + $0x28] sm:$0xff] (!%p138_p2)  ;;  %vm1339_vm9 = vcmask (!%p138_p2), 744448   ;;  %v1776_v57 = vld [vmem:[%s2118_s1 + $0x30] sm:$0xff] (!%p138_p2) }
   0xa   : > { %v1782_v62 = vld [vmem:[%s2118_s1 + $0x38] sm:$0xff] (!%p138_p2)  ;;  %vm1506_vm10 = vcmask (!%p138_p2), 736256  }
   0xd   : > { %s2122_s13 = smov (!%p161_p3, %s1733_s13), 1 }
   0xe   : > { %s1796_s14 = sshll.u32 %s2122_s13, 4 }
   0xf   : > { %s165_s17 = scalar_lea.vmem %s2117_s0, %s1796_s14 }
  0x10   : > { %v1954_v1 = vld [vmem:[%s165_s17] sm:$0xff]  ;;  %v1959_v3 = vld [vmem:[%s165_s17 + $0x8] sm:$0xff] }
  0x11   : > { %180 = vrot.lane.b32.xlu1 %v1954_v1, %s1908_s18  ;;  %v178_v2 = vcombine.high %v1954_v1, %v1954_v1  ;;  %v179_v4 = vcombine.high %v1959_v3, %v1959_v3 }
  0x13   : > { %182 = vrot.lane.b32.xlu0 %v178_v2, %s1908_s18 }
  0x15   : > { %496 = vrot.lane.b32.xlu1 %v1954_v1, %s1909_s19 }
  0x17   : > { %184 = vrot.lane.b32.xlu0 %v1959_v3, %s1908_s18 }
  0x19   : > { %498 = vrot.lane.b32.xlu1 %v178_v2, %s1909_s19 }
  0x1b   : > { %500 = vrot.lane.b32.xlu0 %v1959_v3, %s1909_s19 }
  0x1d   : > { %667 = vrot.lane.b32.xlu1 %v1959_v3, %s1911_s20 }
  0x1f   : > { %665 = vrot.lane.b32.xlu0 %v178_v2, %s1911_s20 }
  0x21   : > { %186 = vrot.lane.b32.xlu1 %v179_v4, %s1908_s18 }
  0x23   : > { %663 = vrot.lane.b32.xlu0 %v1954_v1, %s1911_s20 }
  0x25   : > { %834 = vrot.lane.b32.xlu1 %v1959_v3, %s1912_s21 }
  0x27   : > { %832 = vrot.lane.b32.xlu0 %v178_v2, %s1912_s21 }
  0x29   : > { %502 = vrot.lane.b32.xlu1 %v179_v4, %s1909_s19 }
  0x2b   : > { %830 = vrot.lane.b32.xlu0 %v1954_v1, %s1912_s21 }
  0x2d   : > { %1001 = vrot.lane.b32.xlu1 %v1959_v3, %s1913_s22 }
  0x2f   : > { %999 = vrot.lane.b32.xlu0 %v178_v2, %s1913_s22 }
  0x31   : > { %669 = vrot.lane.b32.xlu1 %v179_v4, %s1911_s20 }
  0x33   : > { %997 = vrot.lane.b32.xlu0 %v1954_v1, %s1913_s22 }
  0x35   : > { %1166 = vrot.lane.b32.xlu1 %v178_v2, %s1914_s23 }
  0x37   : > { %836 = vrot.lane.b32.xlu0 %v179_v4, %s1912_s21  ;;  %s1876_s21 = smul.u32 24, %s2122_s13 }
  0x39   : > { %1164 = vrot.lane.b32.xlu1 %v1954_v1, %s1914_s23 }
  0x3b   : > { %1168 = vrot.lane.b32.xlu0 %v1959_v3, %s1914_s23 }
  0x3d   : > { %1170 = vrot.lane.b32.xlu1 %v179_v4, %s1914_s23 }
  0x3f   : > { %1003 = vrot.lane.b32.xlu0 %v179_v4, %s1913_s22 }
  0x41   : > { %1335 = vrot.lane.b32.xlu1 %v1959_v3, %s1915_s24 }
  0x43   : > { %1333 = vrot.lane.b32.xlu0 %v178_v2, %s1915_s24 }
  0x45   : > { %1337 = vrot.lane.b32.xlu1 %v179_v4, %s1915_s24 }
  0x47   : > { %1331 = vrot.lane.b32.xlu0 %v1954_v1, %s1915_s24  ;;  %s170_s24 = scalar_lea.vmem %s2120_s3, %s1876_s21 }
  0x49   : > { %1502 = vrot.lane.b32.xlu1 %v1959_v3, %s1916_s25 }
  0x4b   : > { %1500 = vrot.lane.b32.xlu0 %v178_v2, %s1916_s25 }
  0x4d   : > { %1498 = vrot.lane.b32.xlu1 %v1954_v1, %s1916_s25 }
  0x4f   : > { %1504 = vrot.lane.b32.xlu0 %v179_v4, %s1916_s25 }
  0x53   : > { %1666 = vperm.xlu0 %1896, %v1663_v6   ;;  %v1788_v6 = vld [vmem:[%s2118_s1 + $0x40] sm:$0xff] }
  0x83   : > { %v181_v7 = vpop.permute.xlu1 %180 }
  0x85   : > { %v183_v8 = vpop.permute.xlu0 %182 }
  0x86   : > { %v189_v14 = vsel %vm188_vm1, %v181_v7, %v183_v8 }
  0x87   : > { %v497_v9 = vpop.permute.xlu1 %496 }
  0x89   : > { %v185_v10 = vpop.permute.xlu0 %184 }
  0x8a   : > { %v190_v11 = vsel %vm188_vm1, %v183_v8, %v185_v10 }
  0x8b   : > { %v499_v13 = vpop.permute.xlu1 %498  ;;  %1742 = vmatprep.subr.msk.mxu0 %vm196_vm2, %v190_v11 }
  0x8c   : > { %1743 = vmatpush1.msk.msra.mxu0 %vm196_vm2, %v189_v14  ;;  %v505_v20 = vsel %vm504_vm4, %v497_v9, %v499_v13 }
  0x8d   : > { %1744 = vmatmul.mubr.msk.f32.vlgmr.msra.gmra.mrb[0].mxu0 %vm192_vm3, %v1741_v12  ;;  %1747 = vmatprep.subr.msk.mxu0 %vm196_vm2, %v178_v2  ;;  %v501_v15 = vpop.permute.xlu0 %500 }
  0x8e   : > { %v506_v16 = vsel %vm504_vm4, %v499_v13, %v501_v15  ;;  %1748 = vmatpush1.msk.msra.mxu0 %vm196_vm2, %v1954_v1  ;;  %417 = vmatprep.mubr.f32.mxu0 %v1907_v0 }
  0x8f   : > { %v668_v17 = vpop.permute.xlu1 %667  ;;  %1753 = vmatprep.subr.msk.mxu0 %vm196_vm2, %v506_v16 }
  0x91   : > { %v666_v18 = vpop.permute.xlu0 %665 }
  0x92   : > { %v673_v22 = vsel %vm671_vm5, %v666_v18, %v668_v17 }
  0x93   : > { %v187_v21 = vpop.permute.xlu1 %186 }
  0x94   : > { %v191_v23 = vsel %vm188_vm1, %v185_v10, %v187_v21 }
  0x95   : > { %1816 = vmatpush3.msk.msra.mxu1 %vm196_vm2, %v191_v23  ;;  %1749 = vmatmul.mubr.msk.f32.vlgmr.msra.gmra.mrb[0].mxu0 %vm192_vm3, %v173_v19  ;;  %v664_v24 = vpop.permute.xlu0 %663 }
  0x96   : > { %1754 = vmatpush1.msk.msra.mxu0 %vm196_vm2, %v505_v20  ;;  %1818 = vmatmul.mubr.msk.f32.vlgmr.msra.gmra.mrb[0].mxu1 %vm192_vm3, %v1741_v12  ;;  %v672_v31 = vsel %vm671_vm5, %v664_v24, %v666_v18 }
  0x97   : > { %1759 = vmatprep.subr.msk.mxu0 %vm196_vm2, %v673_v22  ;;  %v835_v25 = vpop.permute.xlu1 %834  ;;  %1820 = vmatprep.subr.mxu1 %v1907_v0 }
  0x98   : > { %1821 = vmatpush3.msk.msra.mxu1 %vm196_vm2, %v1959_v3  ;;  %1822 = vmatprep.mubr.msk.f32.mxu1 %vm1910_vm0, %v1907_v0 }
  0x99   : > { %v833_v26 = vpop.permute.xlu0 %832  ;;  %581 = vmatprep.mubr.f32.mxu0 %v1907_v0  ;;  %1825 = vmatprep.subr.mxu1 %v1907_v0 }
  0x9a   : > { %1823 = vmatmul.mubr.msk.f32.vlgmr.msra.gmra.mrb[2].mxu1 %vm192_vm3, %v173_v19  ;;  %v840_v29 = vsel %vm838_vm6, %v833_v26, %v835_v25 }
  0x9b   : > { %v503_v28 = vpop.permute.xlu1 %502  ;;  %1827 = vmatprep.mubr.msk.f32.mxu1 %vm1910_vm0, %v1907_v0 }
  0x9c   : > { %v507_v30 = vsel %vm504_vm4, %v501_v15, %v503_v28 }
  0x9d   : > { %1755 = vmatmul.mubr.msk.f32.vlgmr.msra.gmra.mrb[0].mxu0 %vm192_vm3, %v1752_v27  ;;  %1826 = vmatpush3.msk.msra.mxu1 %vm196_vm2, %v507_v30  ;;  %v831_v32 = vpop.permute.xlu0 %830 }
  0x9e   : > { %1760 = vmatpush1.msk.msra.mxu0 %vm196_vm2, %v672_v31  ;;  %748 = vmatprep.mubr.f32.mxu0 %v1907_v0  ;;  %v839_v39 = vsel %vm838_vm6, %v831_v32, %v833_v26 }
  0x9f   : > { %1765 = vmatprep.subr.msk.mxu0 %vm196_vm2, %v840_v29  ;;  %v1002_v33 = vpop.permute.xlu1 %1001  ;;  %1830 = vmatprep.subr.mxu1 %v1907_v0 }
  0xa0   : > { %1828 = vmatmul.mubr.msk.f32.vlgmr.msra.gmra.mrb[4].mxu1 %vm192_vm3, %v1752_v27 }
  0xa1   : > { %v1000_v34 = vpop.permute.xlu0 %999  ;;  %1832 = vmatprep.mubr.msk.f32.mxu1 %vm1910_vm0, %v1907_v0 }
  0xa2   : > { %v1007_v37 = vsel %vm1005_vm7, %v1000_v34, %v1002_v33 }
  0xa3   : > { %v670_v36 = vpop.permute.xlu1 %669 }
  0xa4   : > { %v674_v38 = vsel %vm671_vm5, %v668_v17, %v670_v36 }
  0xa5   : > { %1761 = vmatmul.mubr.msk.f32.vlgmr.msra.gmra.mrb[0].mxu0 %vm192_vm3, %v1758_v35  ;;  %1831 = vmatpush3.msk.msra.mxu1 %vm196_vm2, %v674_v38  ;;  %v998_v40 = vpop.permute.xlu0 %997 }
  0xa6   : > { %1766 = vmatpush1.msk.msra.mxu0 %vm196_vm2, %v839_v39  ;;  %1835 = vmatprep.subr.mxu1 %v1907_v0  ;;  %v1006_v46 = vsel %vm1005_vm7, %v998_v40, %v1000_v34 }
  0xa7   : > { %1771 = vmatprep.subr.msk.mxu0 %vm196_vm2, %v1007_v37  ;;  %v1167_v41 = vpop.permute.xlu1 %1166  ;;  %1833 = vmatmul.mubr.msk.f32.vlgmr.msra.gmra.mrb[6].mxu1 %vm192_vm3, %v1758_v35 }
  0xa8   : > { %915 = vmatprep.mubr.f32.mxu0 %v1907_v0  ;;  %1837 = vmatprep.mubr.msk.f32.mxu1 %vm1910_vm0, %v1907_v0 }
  0xa9   : > { %v837_v42 = vpop.permute.xlu0 %836 }
  0xaa   : > { %v841_v43 = vsel %vm838_vm6, %v835_v25, %v837_v42 }
  0xab   : > { %1836 = vmatpush3.msk.msra.mxu1 %vm196_vm2, %v841_v43  ;;  %v1165_v45 = vpop.permute.xlu1 %1164 }
  0xac   : > { %1838 = vmatmul.mubr.msk.f32.vlgmr.msra.gmra.mrb[8].mxu1 %vm192_vm3, %v1764_v44  ;;  %1840 = vmatprep.subr.mxu1 %v1907_v0  ;;  %v1173_v54 = vsel %vm1172_vm8, %v1165_v45, %v1167_v41 }
  0xad   : > { %1767 = vmatmul.mubr.msk.f32.vlgmr.msra.gmra.mrb[0].mxu0 %vm192_vm3, %v1764_v44  ;;  %v1169_v47 = vpop.permute.xlu0 %1168  ;;  %1842 = vmatprep.mubr.msk.f32.mxu1 %vm1910_vm0, %v1907_v0 }
  0xae   : > { %1772 = vmatpush1.msk.msra.mxu0 %vm196_vm2, %v1006_v46  ;;  %v1174_v48 = vsel %vm1172_vm8, %v1167_v41, %v1169_v47  ;;  %1082 = vmatprep.mubr.f32.mxu0 %v1907_v0 }
  0xaf   : > { %1777 = vmatprep.subr.msk.mxu0 %vm196_vm2, %v1174_v48  ;;  %v1171_v49 = vpop.permute.xlu1 %1170 }
  0xb0   : > { %v1175_v52 = vsel %vm1172_vm8, %v1169_v47, %v1171_v49 }
  0xb1   : > { %v1004_v50 = vpop.permute.xlu0 %1003 }
  0xb2   : > { %v1008_v53 = vsel %vm1005_vm7, %v1002_v33, %v1004_v50 }
  0xb3   : > { %1841 = vmatpush3.msk.msra.mxu1 %vm196_vm2, %v1008_v53  ;;  %v1336_v55 = vpop.permute.xlu1 %1335 }
  0xb4   : > { %1843 = vmatmul.mubr.msk.f32.vlgmr.msra.gmra.mrb[10].mxu1 %vm192_vm3, %v1770_v51  ;;  %1845 = vmatprep.subr.mxu1 %v1907_v0 }
  0xb5   : > { %1773 = vmatmul.mubr.msk.f32.vlgmr.msra.gmra.mrb[0].mxu0 %vm192_vm3, %v1770_v51  ;;  %1846 = vmatpush3.msk.msra.mxu1 %vm196_vm2, %v1175_v52  ;;  %v1334_v56 = vpop.permute.xlu0 %1333 }
  0xb6   : > { %1778 = vmatpush1.msk.msra.mxu0 %vm196_vm2, %v1173_v54  ;;  %v1341_v58 = vsel %vm1339_vm9, %v1334_v56, %v1336_v55  ;;  %1847 = vmatprep.mubr.msk.f32.mxu1 %vm1910_vm0, %v1907_v0 }
  0xb7   : > { %v1338_v59 = vpop.permute.xlu1 %1337  ;;  %1850 = vmatprep.subr.mxu1 %v1907_v0  ;;  %1783 = vmatprep.subr.msk.mxu0 %vm196_vm2, %v1341_v58 }
  0xb8   : > { %v1342_v60 = vsel %vm1339_vm9, %v1336_v55, %v1338_v59  ;;  %1848 = vmatmul.mubr.msk.f32.vlgmr.msra.gmra.mrb[12].mxu1 %vm192_vm3, %v1776_v57  ;;  %1249 = vmatprep.mubr.f32.mxu0 %v1907_v0 }
  0xb9   : > { %v1332_v61 = vpop.permute.xlu0 %1331  ;;  %1851 = vmatpush3.msk.msra.mxu1 %vm196_vm2, %v1342_v60  ;;  %1852 = vmatprep.mubr.msk.f32.mxu1 %vm1910_vm0, %v1907_v0 }
  0xba   : > { %1855 = vmatprep.subr.mxu1 %v1907_v0  ;;  %v1340_v63 = vsel %vm1339_vm9, %v1332_v61, %v1334_v56 }
  0xbb   : > { %v1503_v1 = vpop.permute.xlu1 %1502 }
  0xbc   : > { %1853 = vmatmul.mubr.msk.f32.vlgmr.msra.gmra.mrb[14].mxu1 %vm192_vm3, %v1782_v62 }
  0xbd   : > { %1779 = vmatmul.mubr.msk.f32.vlgmr.msra.gmra.mrb[0].mxu0 %vm192_vm3, %v1776_v57  ;;  %v1501_v2 = vpop.permute.xlu0 %1500  ;;  %1857 = vmatprep.mubr.msk.f32.mxu1 %vm1910_vm0, %v1907_v0 }
  0xbe   : > { %1784 = vmatpush1.msk.msra.mxu0 %vm196_vm2, %v1340_v63  ;;  %v1508_v3 = vsel %vm1506_vm10, %v1501_v2, %v1503_v1  ;;  %1416 = vmatprep.mubr.f32.mxu0 %v1907_v0 }
  0xbf   : > { %1789 = vmatprep.subr.msk.mxu0 %vm196_vm2, %v1508_v3  ;;  %v1499_v4 = vpop.permute.xlu1 %1498 }
  0xc0   : > { %v1507_v8 = vsel %vm1506_vm10, %v1499_v4, %v1501_v2 }
  0xc1   : > { %v1505_v5 = vpop.permute.xlu0 %1504 }
  0xc2   : > { %v1509_v7 = vsel %vm1506_vm10, %v1503_v1, %v1505_v5 }
  0xc3   : > { %1856 = vmatpush3.msk.msra.mxu1 %vm196_vm2, %v1509_v7 }
  0xc4   : > { %1858 = vmatmul.mubr.msk.f32.vlgmr.msra.gmra.mrb[16].mxu1 %vm192_vm3, %v1788_v6 }
  0xc5   : > { %1785 = vmatmul.mubr.msk.f32.vlgmr.msra.gmra.mrb[0].mxu0 %vm192_vm3, %v1782_v62 }
  0xc6   : > { %1790 = vmatpush1.msk.msra.mxu0 %vm196_vm2, %v1507_v8  ;;  %1583 = vmatprep.mubr.f32.mxu0 %v1907_v0 }
  0xcd   : > { %1791 = vmatmul.mubr.msk.f32.vlgmr.msra.gmra.mrb[0].mxu0 %vm192_vm3, %v1788_v6 }
  0xd2   : > { %v1667_v32 = vpop.permute.xlu0 %1666 }
 0x169   : > { %v340_v9 = vpop.f32.mrb[0].mxu1 }
 0x16a   : > { %v1819_v10 = vpop.f32.mrb[1].mxu1 }
 0x16d   : > { %v490_v11 = vpop.f32.mrb[2].mxu1 }
 0x16e   : > { %v491_v12 = vadd.f32 %v490_v11, %v340_v9  ;;  %v1824_v13 = vpop.f32.mrb[3].mxu1 }
 0x173   : > { %v654_v14 = vpop.f32.mrb[4].mxu1 }
 0x174   : > { %v660_v15 = vadd.f32 %v654_v14, %v491_v12  ;;  %v1829_v16 = vpop.f32.mrb[5].mxu1 }
 0x17a   : > { %v821_v17 = vpop.f32.mrb[6].mxu1 }
 0x17b   : > { %v827_v18 = vadd.f32 %v821_v17, %v660_v15  ;;  %v1834_v19 = vpop.f32.mrb[7].mxu1 }
 0x17f   : > { %v988_v20 = vpop.f32.mrb[8].mxu1 }
 0x180   : > { %v994_v21 = vadd.f32 %v988_v20, %v827_v18  ;;  %v1839_v22 = vpop.f32.mrb[9].mxu1 }
 0x187   : > { %v1155_v23 = vpop.f32.mrb[10].mxu1 }
 0x188   : > { %v1161_v24 = vadd.f32 %v1155_v23, %v994_v21  ;;  %v1844_v0 = vpop.f32.mrb[11].mxu1 }
 0x18b   : > { %v1322_v25 = vpop.f32.mrb[12].mxu1 }
 0x18c   : > { %v1328_v26 = vadd.f32 %v1322_v25, %v1161_v24  ;;  %v1849_v27 = vpop.f32.mrb[13].mxu1 }
 0x18f   : > { %v1489_v28 = vpop.f32.mrb[14].mxu1 }
 0x190   : > { %v1495_v29 = vadd.f32 %v1489_v28, %v1328_v26  ;;  %v1854_v30 = vpop.f32.mrb[15].mxu1 }
 0x197   : > { %v1656_v31 = vpop.f32.mrb[16].mxu1 }
 0x198   : > { %v1662_v33 = vadd.f32 %v1656_v31, %v1495_v29  ;;  %v1859_v34 = vpop.f32.mrb[17].mxu1 }
 0x19a   : > { %v1671_v35 = vadd.f32 %v1667_v32, %v1662_v33 }
 0x19c   : > { %v1674_v36 = vmax.f32 %v1671_v35, 0.0 }
 0x19e   : > { %1677 = vst [vmem:[%s170_s24 + $0x10] sm:$0xff] %v1674_v36 }
 0x1a0   : > { %v1585_v37 = vpop.f32.mrb[0].mxu0 }
 0x1a1   : > { %v1669_v38 = vadd.f32 %v1667_v32, %v1585_v37  ;;  %v1587_v39 = vpop.f32.mrb[1].mxu0 }
 0x1a2   : > { %v1670_v40 = vadd.f32 %v1667_v32, %v1587_v39 }
 0x1a3   : > { %v1672_v41 = vmax.f32 %v1669_v38, 0.0 }
 0x1a4   : > { %v1673_v42 = vmax.f32 %v1670_v40, 0.0 }
 0x1a5   : > { %1675 = vst [vmem:[%s170_s24] sm:$0xff] %v1672_v41 }
 0x1a6   : > { %1676 = vst [vmem:[%s170_s24 + $0x8] sm:$0xff] %v1673_v42 }
 0x1a7 PF: > { %s13_s12 = sadd.s32 1, %s1905_s12  }
 0x1a8   : > { %p10_p4 = scmp.ge.s32.totalorder %s13_s12, 4  }
 0x1aa   :  { %12 = sbr.rel (!%p10_p4) target bundleno = 1 (0x1), region = 70 }

</bundles_post_ra>
